<compile_context>
chip_gen: v6e
topology: v6e:2x2x1
jax: 0.10.0
libtpu: 0.0.40
codegen_flags: <defaults>
</compile_context>

<pallas_src>
import jax
import jax.numpy as jnp
from jax.experimental import pallas as pl
from jax.experimental.pallas import tpu as pltpu


def _choose_tiles(src_len, block_budget_bytes, max_tn=2048):
    """Pick the (TM, TN) plane tile.

    TN (lane dim) grows first toward the full row (or max_tn, a multiple of
    128); TM (sublane dim) is then budgeted so one f32 plane stays within
    block_budget_bytes (hard-capped at 12 MiB for v7x).  Tiles need not
    divide src_len: ragged edge blocks are masked by Pallas.
    """
    budget = min(int(block_budget_bytes), 12 << 20)
    if src_len <= max_tn:
        tn = src_len                              # full-row lane extent
    else:
        tn = max(128, (max_tn // 128) * 128)      # multiple of 128
    tm_cap = budget // (4 * tn)
    if src_len <= tm_cap:
        tm = src_len
    else:
        tm = max(8, (tm_cap // 8) * 8)            # multiple of 8 sublanes
    return tm, tn


def forgetting_forward(time_done, num_heads, a=0.1, b=1.0, c=1.0, d=1.0,
                       block_budget_bytes=6 << 20, max_tn=2048,
                       approx_recip=False):
    """JAX/Pallas equivalent of forgetting().forward(time_done, num_heads)."""
    time_done = time_done.astype(jnp.float32)
    bsz, src_len = time_done.shape

    tm, tn = _choose_tiles(src_len, block_budget_bytes, max_tn)
    n_i = pl.cdiv(src_len, tm)
    n_j = pl.cdiv(src_len, tn)

    # i-times sublane-major (column), j-times lane-major (row).
    t_col = time_done.reshape(bsz, src_len, 1)
    t_row = time_done.reshape(bsz, 1, src_len)

    # Module-init constants folded into immediates (c*b fused into one scale).
    cb = float(c) * float(b)
    a_f = float(a)
    d_f = float(d)

    def kernel(ti_ref, tj_ref, o_ref, plane_ref):
        # ti_ref: (1, tm, 1), tj_ref: (1, 1, tn), o_ref: (1, tm, tn)
        # plane_ref: (tm, tn) VMEM scratch, persists across grid steps.
        @pl.when(pl.program_id(3) == 0)          # first head of this tile
        def _():
            ti = ti_ref[0]                       # (tm, 1) column for this batch
            tj = tj_ref[0]                       # (1, tn) row
            x = (ti - tj) + a_f                  # (tm, tn) pairwise diff + a
            if approx_recip:
                plane_ref[...] = cb * pl.reciprocal(x, approx=True) + d_f
            else:
                plane_ref[...] = cb / x + d_f    # exact division for parity
        # Every head of this batch writes the same plane to its own HBM slice.
        o_ref[0] = plane_ref[...]

    out_block_bytes = tm * tn * 4
    # 2x output double-buffer + 1x scratch + inputs + slack; floor at 32 MiB
    # so v5e (16 MiB default scoped) keeps double-buffering.
    vmem_limit = int(max(32 << 20, 4 * out_block_bytes + (2 << 20)))

    return pl.pallas_call(
        kernel,
        out_shape=jax.ShapeDtypeStruct((bsz * num_heads, src_len, src_len),
                                       jnp.float32),
        grid=(bsz, n_i, n_j, num_heads),
        in_specs=[
            pl.BlockSpec((1, tm, 1), lambda bi, ii, jj, h: (bi, ii, 0)),
            pl.BlockSpec((1, 1, tn), lambda bi, ii, jj, h: (bi, 0, jj)),
        ],
        out_specs=pl.BlockSpec(
            (1, tm, tn), lambda bi, ii, jj, h: (bi * num_heads + h, ii, jj)),
        scratch_shapes=[pltpu.VMEM((tm, tn), jnp.float32)],
        compiler_params=pltpu.CompilerParams(
            dimension_semantics=("parallel", "parallel", "parallel",
                                 "arbitrary"),
            vmem_limit_bytes=vmem_limit),
    )(t_col, t_row)


def _reference(time_done, num_heads, a, b, c, d):
    """Pure-JAX reference mirroring the PyTorch forward exactly."""
    time_done = time_done.astype(jnp.float32)
    t_exp = jnp.repeat(time_done, num_heads, axis=0)     # (bsz*H, S)
    ttt = t_exp[:, :, None] - t_exp[:, None, :]           # (bsz*H, S, S)
    return c * (b / (ttt + a)) + d


def _make_times(key, bsz, src_len):
    # Monotone "times" keep t[i]-t[j] away from the pole at -a for a clean
    # numeric comparison (the torch module would also blow up at the pole).
    steps = jax.random.uniform(key, (bsz, src_len), minval=0.5, maxval=1.5,
                               dtype=jnp.float32)
    return jnp.cumsum(steps, axis=1)


if __name__ == "__main__":
    # Deterministic parameters per nn.Module.__init__: a=0.1, b=1, c=1, d=1.
    a, b, c, d = 0.1, 1.0, 1.0, 1.0
    key = jax.random.PRNGKey(0)

    # (bsz, src_len, num_heads, block_budget_bytes, max_tn)
    cases = [
        (2, 16, 4, 6 << 20, 2048),          # tiny: single (16,16) tile per batch
        (2, 200, 2, 4 * 128 * 200, 2048),   # ragged i-tiles (tm=128), tn=full 200
        (2, 200, 3, 4 * 64 * 128, 128),     # ragged i AND j tiles (masked lanes)
    ]

    for idx, (bsz, src_len, num_heads, budget, mtn) in enumerate(cases):
        key, sub = jax.random.split(key)
        time_done = _make_times(sub, bsz, src_len)

        out = forgetting_forward(time_done, num_heads, a, b, c, d,
                                 block_budget_bytes=budget, max_tn=mtn)
        out = jax.block_until_ready(out)

        ref = _reference(time_done, num_heads, a, b, c, d)
        assert out.shape == (bsz * num_heads, src_len, src_len), (idx, out.shape)
        assert jnp.allclose(out, ref, rtol=1e-5, atol=1e-5), f"mismatch in case {idx}"

    print("KERNEL_OK")
</pallas_src>

<mosaic_0001>
module attributes {stable_mosaic.version = 11 : i64} {
  func.func @kernel(%arg0: i32, %arg1: i32, %arg2: i32, %arg3: i32, %arg4: memref<1x16x1xf32, #tpu.memory_space<vmem>>, %arg5: memref<1x1x16xf32, #tpu.memory_space<vmem>>, %arg6: memref<1x16x16xf32, #tpu.memory_space<vmem>>, %arg7: memref<16x16xf32, #tpu.memory_space<vmem>>) attributes {dimension_semantics = [#tpu.dimension_semantics<parallel>, #tpu.dimension_semantics<parallel>, #tpu.dimension_semantics<parallel>, #tpu.dimension_semantics<arbitrary>], iteration_bounds = array<i64: 2, 1, 1, 4>, scalar_prefetch = 0 : i64, scratch_operands = 1 : i64, tpu.core_type = #tpu.core_type<tc>, window_params = [{transform_indices = @transform_0, window_bounds = array<i64: 1, 16, 1>}, {transform_indices = @transform_1, window_bounds = array<i64: 1, 1, 16>}, {transform_indices = @transform_2, window_bounds = array<i64: 1, 16, 16>}]} {
    %c0_i32 = arith.constant 0 : i32
    %0 = arith.cmpi eq, %arg3, %c0_i32 : i32
    %1 = arith.extui %0 : i1 to i32
    %c0_i32_0 = arith.constant 0 : i32
    %2 = arith.cmpi ne, %1, %c0_i32_0 : i32
    scf.if %2 {
      %c0_5 = arith.constant 0 : index
      %c0_6 = arith.constant 0 : index
      %c0_7 = arith.constant 0 : index
      %7 = vector.load %arg4[%c0_5, %c0_6, %c0_7] : memref<1x16x1xf32, #tpu.memory_space<vmem>>, vector<1x16x1xf32>
      %8 = vector.shape_cast %7 : vector<1x16x1xf32> to vector<16x1xf32>
      %c0_8 = arith.constant 0 : index
      %c0_9 = arith.constant 0 : index
      %c0_10 = arith.constant 0 : index
      %9 = vector.load %arg5[%c0_8, %c0_9, %c0_10] : memref<1x1x16xf32, #tpu.memory_space<vmem>>, vector<1x1x16xf32>
      %10 = vector.shape_cast %9 : vector<1x1x16xf32> to vector<1x16xf32>
      %11 = vector.broadcast %8 : vector<16x1xf32> to vector<16x16xf32>
      %12 = vector.broadcast %10 : vector<1x16xf32> to vector<16x16xf32>
      %13 = arith.subf %11, %12 : vector<16x16xf32>
      %cst = arith.constant 1.000000e-01 : f32
      %14 = vector.broadcast %cst : f32 to vector<16x16xf32>
      %15 = arith.addf %13, %14 : vector<16x16xf32>
      %cst_11 = arith.constant 1.000000e+00 : f32
      %16 = vector.broadcast %cst_11 : f32 to vector<16x16xf32>
      %17 = arith.divf %16, %15 : vector<16x16xf32>
      %cst_12 = arith.constant 1.000000e+00 : f32
      %18 = vector.broadcast %cst_12 : f32 to vector<16x16xf32>
      %19 = arith.addf %17, %18 : vector<16x16xf32>
      %c0_13 = arith.constant 0 : index
      %c0_14 = arith.constant 0 : index
      %20 = vector.load %arg7[%c0_13, %c0_14] : memref<16x16xf32, #tpu.memory_space<vmem>>, vector<16x16xf32>
      tpu.vector_store %arg7[%c0_13, %c0_14], %19 {strides = array<i32>} : memref<16x16xf32, #tpu.memory_space<vmem>>, vector<16x16xf32>,
    } else {
    }
    %c0 = arith.constant 0 : index
    %c0_1 = arith.constant 0 : index
    %3 = vector.load %arg7[%c0, %c0_1] : memref<16x16xf32, #tpu.memory_space<vmem>>, vector<16x16xf32>
    %c0_2 = arith.constant 0 : index
    %c0_3 = arith.constant 0 : index
    %c0_4 = arith.constant 0 : index
    %4 = vector.load %arg6[%c0_2, %c0_3, %c0_4] : memref<1x16x16xf32, #tpu.memory_space<vmem>>, vector<1x16x16xf32>
    %5 = vector.shape_cast %4 : vector<1x16x16xf32> to vector<16x16xf32>
    %6 = vector.shape_cast %3 : vector<16x16xf32> to vector<1x16x16xf32>
    tpu.vector_store %arg6[%c0_2, %c0_3, %c0_4], %6 {strides = array<i32>} : memref<1x16x16xf32, #tpu.memory_space<vmem>>, vector<1x16x16xf32>,
    return
  }
  func.func @transform_0(%arg0: i32, %arg1: i32, %arg2: i32, %arg3: i32) -> (i32, i32, i32) {
    %c0_i32 = arith.constant 0 : i32
    %c0_i32_0 = arith.constant 0 : i32
    return %arg0, %arg1, %c0_i32 : i32, i32, i32
  }
  func.func @transform_1(%arg0: i32, %arg1: i32, %arg2: i32, %arg3: i32) -> (i32, i32, i32) {
    %c0_i32 = arith.constant 0 : i32
    %c0_i32_0 = arith.constant 0 : i32
    return %arg0, %c0_i32, %arg2 : i32, i32, i32
  }
  func.func @transform_2(%arg0: i32, %arg1: i32, %arg2: i32, %arg3: i32) -> (i32, i32, i32) {
    %c4_i32 = arith.constant 4 : i32
    %0 = arith.muli %arg0, %c4_i32 : i32
    %1 = arith.addi %0, %arg3 : i32
    %c0_i32 = arith.constant 0 : i32
    return %1, %arg1, %arg2 : i32, i32, i32
  }
}

</mosaic_0001>

<bundles_post_ra>
// kernel: tpu_custom_call.1
= control target key start
LH: loop header
LB: loop body
LE: loop exit
PB: predicated region body
PF: predicated region fallthrough
CT: control target
= control target key end

     0   :  { %7 = vsyncpa [#allocation4], 0  ;;  %s745_s0 = inlined_call_operand.vmem [shape: f32[2,16,1], index: 0, kind: input, shape index: {}]   ;;  %s746_s1 = inlined_call_operand.vmem [shape: f32[2,1,16], index: 1, kind: input, shape index: {}]   ;;  %s747_s2 = inlined_call_operand.hbm [shape: f32[8,16,16], index: 2, kind: output, shape index: {}]  }
   0x1   :  { %9 = vsyncpa [#allocation4 + $0x1], 0  ;;  %s595_s9 = smov 0   ;;  %s597_s10 = smov 0  }
   0x2   :  { %s599_s11 = smov 0   ;;  %s601_s12 = smov 0  }
   0x3   :  { %s603_s13 = smov 0   ;;  %s605_s14 = smov 0  }
   0x4   :  { %s607_s15 = smov 0   ;;  %s609_s16 = smov 0  }
   0x5 LB: > { %s383_s17 = sadd.s32 4294967295, %s574_s16   ;;  %s30_s18 = sadd.s32 1, %s566_s14  ;;  %s574_s16 = sphi %s609_s16, %s15_s16   ;;  %s570_s15 = sphi %s607_s15, %s756_s15   ;;  %s566_s14 = sphi %s605_s14, %s755_s14   ;;  %s562_s13 = sphi %s603_s13, %s754_s13   ;;  %s558_s12 = sphi %s601_s12, %s753_s12   ;;  %s554_s11 = sphi %s599_s11, %s752_s11   ;;  %s550_s10 = sphi %s597_s10, %s751_s10   ;;  %s546_s9 = sphi %s595_s9, %s750_s9  }
   0x6   : > { %s41_s19 = sadd.s32 1, %s570_s15  ;;  %p31_p0 = scmp.ge.s32.totalorder %s30_s18, 4 }
   0x7   : > { %s385_s20 = sshll.u32 %s570_s15, 2  ;;  %s384_s21 = sadd.s32 4294967294, %s574_s16  }
   0x8   : > { %s102_s22 = sadd.s32 %s566_s14, %s385_s20  ;;  %s758_s18 = smov (%p31_p0, %s30_s18), 0 }
   0x9   : > { %s760_s19 = smov (!%p31_p0, %s41_s19), %s570_s15  ;;  %p122_p1 = scmp.ne.s32.totalorder %s554_s11, %s550_s10 }
   0xa   : > { %p123_p2 = scmp.eq.s32.totalorder %s383_s17, 7  ;;  %p43_p3 = scmp.ge.s32.totalorder %s760_s19, 2 }
   0xb   : > { %p128_p4 = scmp.ne.s32.totalorder %s550_s10, %s546_s9  ;;  %p129_p6 = scmp.eq.s32.totalorder %s384_s21, 7 }
   0xc   : > { %p648_p5 = por %p123_p2, %p122_p1  ;;  %s762_s19 = smov (%p43_p3, %s760_s19), 0 }
   0xd   : > { %p654_p7 = por %p129_p6, %p128_p4  ;;  %p389_p8 = scmp.ge.s32.totalorder %s574_s16, 1 }
   0xe   : > { %s386_s25 = sshll.u32 %s762_s19, 2  ;;  %p169_p9 = scmp.lt.s32.totalorder %s574_s16, 9 }
   0xf   : > { %s104_s26 = sadd.s32 %s386_s25, %s758_s18  ;;  %s112_s27 = sadd.s32 1, %s554_s11 }
  0x10   : > { %s105_s28 = ssub.s32 %s102_s22, %s104_s26  ;;  %p170_p10 = pnand %p389_p8, %p169_p9 }
  0x11   : > { %p110_p11 = scmp.eq.s32.totalorder %s105_s28, 0  ;;  %s198_s30 = sand.u32 (!%p170_p10), 1, %s550_s10  }
  0x12   : > { %173 = sbr.rel (%p170_p10) target bundleno = 206 (0xce), region = 28  ;;  %p202_p12 = scmp.lt.s32.totalorder (!%p170_p10), %s562_s13, 1 }
  0x13   : > { %s664_s29 = scalar_select %p110_p11, %s554_s11, %s112_s27  }
  0x14   : > { %s390_s3 = sshll.u32 (!%p170_p10), %s198_s30, 4  ;;  %p393_p13 = scmp.ne.s32.totalorder (!%p170_p10), %s558_s12, 0 }
  0x15   : > { %s677_s22 = scalar_lea.vmem (!%p170_p10), [#allocation3], %s390_s3 }
  0x17   : > { %s203_s4 = scalar_select %p202_p12, %s562_s13, 1 }
  0x18   : > { %223 = sbr.rel (%p393_p13) target bundleno = 180 (0xb4), region = 32 }
  0x19   : > { %s401_s5 = sshll.u32 %s203_s4, 4  ;;  %s216_s8 = scalar_lea.vmem %s746_s1, %s203_s4 }
  0x1a   : > { %s209_s21 = scalar_lea.vmem %s745_s0, %s401_s5 }
  0x1d   : > { %v224_v0 = vld [vmem:[%s209_s21] sm:$0xff]  ;;  %v576_v1 = vmov 0   ;;  %v225_v2 = vld [vmem:[%s209_s21 + $0x8] sm:$0xff]  ;;  %vm253_vm0 = vcmask 130048  }
  0x1e   : > { %477 = vset.pattern.permute.xlu0 %v576_v1  ;;  %v394_v3 = vld [vmem:[%s216_s8] ss:$0 sm:$0xff] }
  0x1f   : > { %229 = vperm.xlu0 %477, %v224_v0  }
  0x23   : > { %234 = vperm.xlu0 %477, %v225_v2  }
  0x9a   : > { %v230_v4 = vpop.permute.xlu0 %229 }
  0x9b   : > { %v243_v5 = vsub.f32 %v230_v4, %v394_v3 }
  0x9d   : > { %v245_v6 = vadd.f32 0.1, %v243_v5 }
  0x9e   : > { %v235_v7 = vpop.permute.xlu0 %234 }
  0x9f   : > { %478 = vrcp.f32 %v245_v6  ;;  %v244_v8 = vsub.f32 %v235_v7, %v394_v3 }
  0xa1   : > { %v246_v9 = vadd.f32 0.1, %v244_v8 }
  0xa3   : > { %480 = vrcp.f32 %v246_v9 }
  0xac   : > { %v479_v10 = vpop.eup %478 }
  0xad   : > { %v251_v11 = vadd.f32 1.0, %v479_v10 }
  0xaf   : > { %254 = vst.msk [vmem:[#allocation2] sm:$0xff] %vm253_vm0, %v251_v11 }
  0xb0   : > { %v481_v12 = vpop.eup %480 }
  0xb1   : > { %v252_v13 = vadd.f32 1.0, %v481_v12 }
  0xb3   : > { %255 = vst.msk [vmem:[#allocation2 + $0x8] sm:$0xff] %vm253_vm0, %v252_v13 }
  0xb4 PF: > { %vm258_vm1 = vcmask 130048   ;;  %s396_s25 = sshll.u32 %s562_s13, 2  ;;  %s280_s27 = sshll.u32 %s677_s22, 4  ;;  %s685_s27 = int_to_ptr.vmem [resolvable:$true] %s280_s27 }
  0xb5   : > { %s270_s26 = sadd.s32 %s558_s12, %s396_s25  ;;  %s694_s6 = scalar_lea.sflag [#allocation4], %s198_s30 }
  0xb6   : > { %v256_v14 = vld [vmem:[#allocation2] sm:$0xff]  ;;  %s402_s28 = sshll.u32 %s270_s26, 8  ;;  %s482_s7 = scalar_lea.vmem %s685_s27, 256 }
  0xb7   : > { %259 = vst.msk [vmem:[%s677_s22] sm:$0xff] %vm258_vm1, %v256_v14  ;;  %s690_s5 = scalar_lea.hbm %s747_s2, %s402_s28  ;;  %p483_p0 = scmp.ne.s32.totalorder %s685_s27, %s482_s7 }
  0xb8   : > { %s577_s12 = smov [#allocation3]  }
  0xb9   : > { %p484_p1 = pnand %p483_p0, %p648_p5  ;;  %s486_s13 = sshll.u32 %s577_s12, 4  ;;  %s487_s13 = int_to_ptr.vmem [resolvable:$false] %s486_s13 }
  0xba   : > { %v257_v15 = vld [vmem:[#allocation2 + $0x8] sm:$0xff]  ;;  %s488_s8 = scalar_lea.vmem %s487_s13, 512  ;;  %p489_p3 = scmp.lt.s32.totalorder %s685_s27, %s487_s13 }
  0xbb   : > { %260 = vst.msk [vmem:[%s677_s22 + $0x8] sm:$0xff] %vm258_vm1, %v257_v15  ;;  %p485_p2 = pneg %p484_p1  ;;  %p490_p4 = scmp.lt.s32.totalorder %s488_s8, %s482_s7 }
  0xbd   : > { %p491_p6 = por %p490_p4, %p489_p3 }
  0xbf   : > { %p492_p8 = pnand %p491_p6, %p485_p2 }
  0xc1   : > { %495 = shalt.err (!%p492_p8)
}
  0xc2   : > { %s496_s30 = scalar_lea.hbm %s690_s5, 256  ;;  %s500_s21 = scalar_lea.hbm %s747_s2, 2048 }
  0xc3   : > { %p497_p9 = scmp.ne.s32.totalorder %s690_s5, %s496_s30  ;;  %p501_p12 = scmp.lt.s32.totalorder %s690_s5, %s747_s2 }
  0xc4   : > { %p502_p13 = scmp.lt.s32.totalorder %s500_s21, %s496_s30 }
  0xc5   : > { %p498_p10 = pnand %p497_p9, %p648_p5 }
  0xc6   : > { %p503_p0 = por %p502_p13, %p501_p12 }
  0xc7   : > { %p499_p11 = pneg %p498_p10 }
  0xc9   : > { %p504_p1 = pnand %p503_p0, %p499_p11 }
  0xcb   : > { %507 = shalt.err (!%p504_p1)
}
  0xcc   : > { %s578_s26 = smov 128   ;;  %s579_s28 = smov 8  }
  0xcd   : > { %403 = dma.vmem_to_hbm [thread:$0]  (%p648_p5), %s685_s27, 256, %s690_s5, %s694_s6, %s578_s26, %s578_s26, %s579_s28  }
  0xce PF: > { %p409_p2 = scmp.ge.s32.totalorder %s574_s16, 2  ;;  %s295_s3 = sand.u32 1, %s546_s9  }
  0xcf   : > { %s296_s4 = scalar_lea.sflag [#allocation4], %s295_s3 }
  0xd0   : > { %p406_p3 = pnand %p409_p2, %p654_p7 }
  0xd2   : > { %p407_p4 = pneg %p406_p3 }
  0xd4   : > { %541 = dma.done.wait (%p407_p4), %s296_s4, 256  }
  0xd5   : > { %543 = vsyncadd (%p407_p4), %s296_s4, 4294967040  ;;  %s15_s16 = sadd.s32 1, %s574_s16   ;;  %s750_s9 = smov %s550_s10 }
  0xd6   : > { %p12_p6 = scmp.ge.s32.totalorder %s15_s16, 10   ;;  %s751_s10 = smov %s554_s11 }
  0xd7   : > { %s752_s11 = smov %s664_s29  ;;  %s753_s12 = smov %s566_s14 }
  0xd8   : > { %s754_s13 = smov %s570_s15  ;;  %s755_s14 = smov %s758_s18 }
  0xd9   : > { %s756_s15 = smov %s762_s19  ;;  %14 = sbr.rel (!%p12_p6) target bundleno = 5 (0x5), region = 70 }
  0xde   :  { %301 = vsyncpa [#allocation4], 1 }
  0xdf   :  { %303 = vsyncpa [#allocation4 + $0x1], 1 }

</bundles_post_ra>
